<compile_context>
chip_gen: v7x
topology: tpu7x:2x2x1
jax: 0.10.0
libtpu: 0.0.40
codegen_flags: <defaults>
</compile_context>

<pallas_src>
from functools import lru_cache
from typing import NamedTuple

import jax
import jax.numpy as jnp
from jax.experimental import pallas as pl
from jax.experimental.pallas import tpu as pltpu


_TINY_BYTES = 1 << 20          # below this, plain jnp.clip beats a pallas_call
_MIN_TILE_BYTES = 256 << 10    # never shrink tiles below this just to add steps


class _ChipParams(NamedTuple):
    target_block_bytes: int
    vmem_limit_bytes: int
    min_grid_steps: int


@lru_cache(maxsize=1)
def _chip_params() -> _ChipParams:
    """Chip-aware tiling parameters (conservative v7x defaults on failure)."""
    vmem_cap = 64 << 20
    try:
        vmem_cap = int(pltpu.get_tpu_info().vmem_capacity_bytes)
    except Exception:
        pass
    if vmem_cap <= (64 << 20):
        # v7x: 64 MiB VMEM per TC.  8 MiB blocks, 2 in + 2 out double-buffered
        # = 32 MiB, 48 MiB scoped limit leaves headroom.
        return _ChipParams(target_block_bytes=8 << 20,
                           vmem_limit_bytes=48 << 20,
                           min_grid_steps=8)
    # v5e / v6e: 128 MiB VMEM.  Same 8 MiB blocks (roofline plateaus there),
    # roomier scoped limit.
    return _ChipParams(target_block_bytes=8 << 20,
                       vmem_limit_bytes=64 << 20,
                       min_grid_steps=8)


def _relu6_kernel(x_ref, o_ref):
    x = x_ref[...]
    zero = jnp.zeros((), x.dtype)
    six = jnp.asarray(6, x.dtype)
    o_ref[...] = jnp.minimum(jnp.maximum(x, zero), six)


def _sublane_multiple(dtype) -> int:
    # Second-to-last block dim must be a multiple of the sublane packing
    # factor (8 for 32-bit, 16 for 16-bit, 32 for 8-bit) unless it equals the
    # full array dim.
    return max(8, 32 // jnp.dtype(dtype).itemsize)


def _round_down(x: int, m: int) -> int:
    return (x // m) * m


def _pick_tile_rows(rows: int, lanes: int, dtype, params: _ChipParams) -> int:
    sub = _sublane_multiple(dtype)
    row_bytes = lanes * jnp.dtype(dtype).itemsize

    # Largest sublane-aligned tile within the per-block byte budget.
    tile = max(sub, _round_down(params.target_block_bytes // row_bytes, sub))
    tile = min(tile, rows)

    # Guarantee enough grid steps for DMA/compute/DMA overlap (and to feed
    # both v7x TensorCores with >= 4 steps each), as long as tiles stay at
    # least _MIN_TILE_BYTES.
    steps_tile = _round_down(rows // params.min_grid_steps, sub)
    floor_rows = max(sub, _round_down(max(_MIN_TILE_BYTES // row_bytes, 1), sub))
    if steps_tile >= floor_rows:
        tile = min(tile, steps_tile)
    else:
        # Small-ish array: settle for >= 2 steps when possible so at least one
        # direction of DMA overlaps with the other.
        half_tile = _round_down(rows // 2, sub)
        if half_tile >= sub:
            tile = min(tile, half_tile)
    return max(tile, sub)


def _run_relu6_2d(x2d: jax.Array) -> jax.Array:
    rows, lanes = x2d.shape
    params = _chip_params()
    tile_rows = _pick_tile_rows(rows, lanes, x2d.dtype, params)
    grid = (pl.cdiv(rows, tile_rows),)
    return pl.pallas_call(
        _relu6_kernel,
        out_shape=jax.ShapeDtypeStruct((rows, lanes), x2d.dtype),
        grid_spec=pltpu.PrefetchScalarGridSpec(
            num_scalar_prefetch=0,
            grid=grid,
            in_specs=[pl.BlockSpec((tile_rows, lanes), lambda i: (i, 0))],
            out_specs=pl.BlockSpec((tile_rows, lanes), lambda i: (i, 0)),
        ),
        # No input_output_aliases: the input is (a reshape of) the caller's
        # non-donated buffer; aliasing would force XLA to copy it first.
        compiler_params=pltpu.CompilerParams(
            dimension_semantics=("parallel",),
            vmem_limit_bytes=params.vmem_limit_bytes,
        ),
    )(x2d)


def relu6(x: jax.Array) -> jax.Array:
    """Elementwise ReLU6 over an arbitrarily-shaped array."""
    orig_shape = x.shape
    n = x.size
    if n == 0:
        return x

    nbytes = n * jnp.dtype(x.dtype).itemsize
    if nbytes < _TINY_BYTES:
        # Single-block territory: a 1-step grid cannot pipeline and the fixed
        # pallas_call launch / DMA-setup overhead dominates; XLA's fused clip
        # is as fast or faster and can fuse into neighboring ops.
        return jnp.clip(x, 0, 6)

    x_flat = jnp.reshape(x, (-1,))

    # Fast path: lane-dense 2-D slab with no padding/copies when the element
    # count divides a lane-multiple width (wide unmasked vst + long DMAs).
    for lanes in (1024, 512, 256, 128):
        if n % lanes == 0:
            y2d = _run_relu6_2d(x_flat.reshape(n // lanes, lanes))
            return y2d.reshape(orig_shape)

    # Ragged size: run the kernel on the 128-aligned prefix and clip the
    # (<128 element) tail with plain jnp.  Keeps kernel traffic at 2N bytes
    # (no full-array pad + slice copies).
    lanes = 128
    n_bulk = _round_down(n, lanes)
    y_bulk = _run_relu6_2d(x_flat[:n_bulk].reshape(n_bulk // lanes, lanes))
    y_tail = jnp.clip(x_flat[n_bulk:], 0, 6)
    y_flat = jnp.concatenate([jnp.reshape(y_bulk, (-1,)), y_tail])
    return y_flat.reshape(orig_shape)


if __name__ == "__main__":
    key = jax.random.PRNGKey(0)
    k1, k2, k3 = jax.random.split(key, 3)

    # NCHW input like the PyTorch module would see (tiny -> fused-clip path).
    x_small = jax.random.normal(k1, (2, 4, 16, 16), dtype=jnp.float32) * 4.0
    # Larger slab exercising the Pallas lane-dense, multi-step pipelined path.
    x_big = jax.random.normal(k2, (4, 8, 128, 128), dtype=jnp.float32) * 4.0
    # Ragged element count (not a multiple of 128) -> bulk + tail path.
    x_ragged = jax.random.normal(k3, (270_000,), dtype=jnp.float32) * 4.0

    ok = True
    for name, x in (("small", x_small), ("big", x_big), ("ragged", x_ragged)):
        y = relu6(x)
        jax.block_until_ready(y)
        y_ref = jnp.clip(x, 0.0, 6.0)
        assert y.shape == x.shape and y.dtype == x.dtype, name
        assert jnp.allclose(y, y_ref), f"mismatch vs reference: {name}"

    print("KERNEL_OK")
</pallas_src>

<mosaic_0001>
module attributes {stable_mosaic.version = 11 : i64} {
  func.func @_relu6_kernel(%arg0: i32, %arg1: memref<64x1024xf32, #tpu.memory_space<vmem>>, %arg2: memref<64x1024xf32, #tpu.memory_space<vmem>>) attributes {dimension_semantics = [#tpu.dimension_semantics<parallel>], iteration_bounds = array<i64: 8>, scalar_prefetch = 0 : i64, scratch_operands = 0 : i64, tpu.core_type = #tpu.core_type<tc>, window_params = [{transform_indices = @transform_0, window_bounds = array<i64: 64, 1024>}, {transform_indices = @transform_1, window_bounds = array<i64: 64, 1024>}]} {
    %c0 = arith.constant 0 : index
    %c0_0 = arith.constant 0 : index
    %0 = vector.load %arg1[%c0, %c0_0] : memref<64x1024xf32, #tpu.memory_space<vmem>>, vector<64x1024xf32>
    %cst = arith.constant 0.000000e+00 : f32
    %1 = vector.broadcast %cst : f32 to vector<64x1024xf32>
    %2 = arith.maximumf %0, %1 : vector<64x1024xf32>
    %cst_1 = arith.constant 6.000000e+00 : f32
    %3 = vector.broadcast %cst_1 : f32 to vector<64x1024xf32>
    %4 = arith.minimumf %2, %3 : vector<64x1024xf32>
    %c0_2 = arith.constant 0 : index
    %c0_3 = arith.constant 0 : index
    %5 = vector.load %arg2[%c0_2, %c0_3] : memref<64x1024xf32, #tpu.memory_space<vmem>>, vector<64x1024xf32>
    tpu.vector_store %arg2[%c0_2, %c0_3], %4 {strides = array<i32>} : memref<64x1024xf32, #tpu.memory_space<vmem>>, vector<64x1024xf32>,
    return
  }
  func.func @transform_0(%arg0: i32) -> (i32, i32) {
    %c0_i32 = arith.constant 0 : i32
    %c0_i32_0 = arith.constant 0 : i32
    return %arg0, %c0_i32 : i32, i32
  }
  func.func @transform_1(%arg0: i32) -> (i32, i32) {
    %c0_i32 = arith.constant 0 : i32
    %c0_i32_0 = arith.constant 0 : i32
    return %arg0, %c0_i32 : i32, i32
  }
}

</mosaic_0001>

<bundles_post_ra>
// kernel: tpu_custom_call.1
= control target key start
LH: loop header
LB: loop body
LE: loop exit
PB: predicated region body
PF: predicated region fallthrough
CT: control target
= control target key end

     0   :  { %6 = vsyncpa [#allocation3], 0  ;;  %s965_s0 = inlined_call_operand.hbm [shape: f32[512,1024], index: 0, kind: input, shape index: {}]   ;;  %s966_s1 = inlined_call_operand.hbm [shape: f32[512,1024], index: 1, kind: output, shape index: {}]  }
   0x1   :  { %8 = vsyncpa [#allocation3 + $0x1], 0 }
   0x2   :  { %9 = vsyncpa [#allocation4], 0 }
   0x3   :  { %11 = vsyncpa [#allocation4 + $0x1], 0  ;;  %s666_s6 = smov 0   ;;  %s668_s7 = smov 0  }
   0x4   :  { %s670_s8 = smov 0   ;;  %s672_s9 = smov 0  }
   0x5 LB: > { %s687_s10 = sadd.s32 4294967295, %s648_s9   ;;  %s482_s11 = sadd.s32 4294967294, %s648_s9   ;;  %s648_s9 = sphi %s672_s9, %s978_s9   ;;  %s644_s8 = sphi %s670_s8, %s977_s8   ;;  %s640_s7 = sphi %s668_s7, %s976_s7   ;;  %s636_s6 = sphi %s666_s6, %s975_s6  }
   0x6   : > { %s691_s12 = sadd.s32 1, %s648_s9   ;;  %s24_s13 = sadd.s32 1, %s644_s8 }
   0x7   : > { %s21_s14 = ssub.s32 %s648_s9, %s691_s12  ;;  %p31_p0 = scmp.ne.s32.totalorder %s644_s8, %s640_s7 }
   0x8   : > { %p22_p1 = scmp.eq.s32.totalorder %s21_s14, 0  ;;  %p32_p2 = scmp.eq.s32.totalorder %s648_s9, 0 }
   0x9   : > { %p37_p3 = scmp.ne.s32.totalorder %s640_s7, %s636_s6  ;;  %p38_p4 = scmp.eq.s32.totalorder %s687_s10, 0 }
   0xa   : > { %s703_s15 = scalar_select %p22_p1, %s644_s8, %s24_s13  }
   0xb   : > { %p705_p5 = por %p32_p2, %p31_p0  ;;  %p709_p6 = por %p38_p4, %p37_p3 }
   0xc   : > { %p61_p7 = scmp.eq.s32.totalorder %s687_s10, 7  ;;  %p67_p8 = scmp.eq.s32.totalorder %s482_s11, 7 }
   0xd   : > { %p514_p9 = scmp.lt.s32.totalorder %s648_s9, 8  ;;  %s87_s20 = sand.u32 1, %s644_s8  }
   0xe   : > { %p715_p10 = por %p61_p7, %p31_p0  ;;  %p719_p11 = por %p67_p8, %p37_p3 }
   0xf   : > { %s499_s21 = sshll.u32 %s648_s9, 13  ;;  %s485_s22 = sshll.u32 %s87_s20, 9 }
  0x10   : > { %s970_s18 = scalar_select %p715_p10, 1, 0 }
  0x11   : > { %s971_s19 = scalar_select %p719_p11, 1, 0 }
  0x12   : > { %s728_s25 = scalar_lea.hbm %s965_s0, %s499_s21  ;;  %s91_s26 = scalar_lea.vmem [#allocation2], %s485_s22 }
  0x13   : > { %s99_s27 = sshll.u32 %s91_s26, 4  ;;  %p732_p12 = pnand %p514_p9, %p705_p5  ;;  %s736_s27 = int_to_ptr.vmem [resolvable:$true] %s99_s27 }
  0x14   : > { %s738_s29 = scalar_lea.sflag [#allocation3], %s87_s20  ;;  %s552_s30 = scalar_lea.hbm %s728_s25, 8192 }
  0x15   : > { %p553_p13 = scmp.ne.s32.totalorder %s728_s25, %s552_s30  ;;  %p554_p0 = pneg %p732_p12 }
  0x16   : > { %s557_s4 = scalar_lea.hbm %s965_s0, 65536  ;;  %p558_p3 = scmp.lt.u32.totalorder %s728_s25, %s965_s0 }
  0x17   : > { %p555_p1 = pnand %p554_p0, %p553_p13  ;;  %p559_p4 = scmp.lt.u32.totalorder %s557_s4, %s552_s30 }
  0x18   : > { %p561_p7 = scmp.lt.u32.totalorder %s552_s30, %s728_s25 }
  0x19   : > { %p556_p2 = pneg %p555_p1  ;;  %p560_p5 = por %p559_p4, %p558_p3 }
  0x1b   : > { %p562_p8 = por %p561_p7, %p560_p5 }
  0x1d   : > { %p563_p9 = pnand %p562_p8, %p556_p2 }
  0x1f   : > { %566 = shalt.err (!%p563_p9)
}
  0x20   : > { %s567_s13 = scalar_lea.vmem %s736_s27, 8192  ;;  %s650_s14 = smov [#allocation2]  }
  0x21   : > { %p568_p13 = scmp.ne.s32.totalorder %s736_s27, %s567_s13  ;;  %s572_s16 = sshll.u32 %s650_s14, 4  ;;  %s573_s16 = int_to_ptr.vmem [resolvable:$false] %s572_s16 }
  0x22   : > { %s574_s20 = scalar_lea.vmem %s573_s16, 16384  ;;  %p575_p10 = scmp.lt.s32.totalorder %s736_s27, %s573_s16 }
  0x23   : > { %p570_p1 = pnand %p568_p13, %p554_p0  ;;  %p576_p3 = scmp.lt.s32.totalorder %s574_s20, %s567_s13 }
  0x25   : > { %p571_p11 = pneg %p570_p1  ;;  %p577_p4 = por %p576_p3, %p575_p10 }
  0x27   : > { %p578_p5 = pnand %p577_p4, %p571_p11 }
  0x29   : > { %581 = shalt.err (!%p578_p5)
}
  0x2a   : > { %s651_s21 = smov 1024   ;;  %s652_s22 = smov 64  }
  0x2b   : > { %509 = dma.hbm_to_vmem [thread:$0]  (!%p732_p12), %s728_s25, 8192, %s736_s27, %s738_s29, %s651_s21, %s651_s21, %s652_s22  }
  0x2c   : > { %p489_p0 = scmp.ge.s32.totalorder %s648_s9, 1  ;;  %p107_p2 = scmp.lt.s32.totalorder %s648_s9, 9 }
  0x2e   : > { %p108_p7 = pnand %p489_p0, %p107_p2 }
  0x2f   : > { %s769_s23 = sand.u32 (!%p108_p7), 1, %s640_s7  }
  0x30   : > { %111 = sbr.rel (%p108_p7) target bundleno = 122 (0x7a), region = 24  ;;  %s490_s24 = sshll.u32 (!%p108_p7), %s769_s23, 9 }
  0x31   : > { %s114_s26 = scalar_lea.sflag (!%p108_p7), [#allocation3], %s769_s23  ;;  %s775_s30 = scalar_lea.vmem (!%p108_p7), [#allocation2], %s490_s24 }
  0x37   : > { %627 = dma.done.wait (%p709_p6), %s114_s26, 8192  }
  0x38   : > { %629 = vsyncadd (%p709_p6), %s114_s26, 4294959104  ;;  %v138_v0 = vld [vmem:[%s775_s30] sm:$0xff]  ;;  %v139_v1 = vld [vmem:[%s775_s30 + $0x8] sm:$0xff]  ;;  %s501_s25 = sshll.u32 %s687_s10, 13  ;;  %s797_s17 = scalar_lea.vmem [#allocation5], %s490_s24 }
  0x39   : > { %v140_v2 = vld [vmem:[%s775_s30 + $0x10] sm:$0xff]  ;;  %v202_v3 = vmax.f32 %v138_v0, 0.0  ;;  %v203_v4 = vmax.f32 %v139_v1, 0.0  ;;  %v141_v6 = vld [vmem:[%s775_s30 + $0x18] sm:$0xff]  ;;  %v142_v7 = vld [vmem:[%s775_s30 + $0x20] sm:$0xff]  ;;  %s409_s27 = sshll.u32 %s797_s17, 4  ;;  %s915_s2 = scalar_lea.hbm %s966_s1, %s501_s25  ;;  %s917_s27 = int_to_ptr.vmem [resolvable:$true] %s409_s27 }
  0x3a   : > { %v204_v5 = vmax.f32 %v140_v2, 0.0  ;;  %v143_v8 = vld [vmem:[%s775_s30 + $0x28] sm:$0xff]  ;;  %v205_v9 = vmax.f32 %v141_v6, 0.0  ;;  %v206_v10 = vmax.f32 %v142_v7, 0.0  ;;  %v144_v12 = vld [vmem:[%s775_s30 + $0x30] sm:$0xff]  ;;  %v145_v13 = vld [vmem:[%s775_s30 + $0x38] sm:$0xff] }
  0x3b   : > { %v207_v11 = vmax.f32 %v143_v8, 0.0  ;;  %v146_v14 = vld [vmem:[%s775_s30 + $0x40] sm:$0xff]  ;;  %v266_v15 = vmin.f32 %v202_v3, 6.0  ;;  %v267_v16 = vmin.f32 %v203_v4, 6.0  ;;  %v208_v18 = vmax.f32 %v144_v12, 0.0  ;;  %v147_v19 = vld [vmem:[%s775_s30 + $0x48] sm:$0xff] }
  0x3c   : > { %v268_v17 = vmin.f32 %v204_v5, 6.0  ;;  %v148_v20 = vld [vmem:[%s775_s30 + $0x50] sm:$0xff]  ;;  %v269_v21 = vmin.f32 %v205_v9, 6.0  ;;  %v270_v22 = vmin.f32 %v206_v10, 6.0  ;;  %v209_v24 = vmax.f32 %v145_v13, 0.0  ;;  %v149_v25 = vld [vmem:[%s775_s30 + $0x58] sm:$0xff] }
  0x3d   : > { %v271_v23 = vmin.f32 %v207_v11, 6.0  ;;  %v150_v26 = vld [vmem:[%s775_s30 + $0x60] sm:$0xff]  ;;  %330 = vst [vmem:[%s797_s17] sm:$0xff] %v266_v15  ;;  %331 = vst [vmem:[%s797_s17 + $0x8] sm:$0xff] %v267_v16  ;;  %v272_v27 = vmin.f32 %v208_v18, 6.0  ;;  %v210_v28 = vmax.f32 %v146_v14, 0.0  ;;  %v211_v29 = vmax.f32 %v147_v19, 0.0 }
  0x3e   : > { %332 = vst [vmem:[%s797_s17 + $0x10] sm:$0xff] %v268_v17  ;;  %v212_v30 = vmax.f32 %v148_v20, 0.0  ;;  %v151_v31 = vld [vmem:[%s775_s30 + $0x68] sm:$0xff]  ;;  %v152_v32 = vld [vmem:[%s775_s30 + $0x70] sm:$0xff]  ;;  %333 = vst [vmem:[%s797_s17 + $0x18] sm:$0xff] %v269_v21  ;;  %v273_v33 = vmin.f32 %v209_v24, 6.0 }
  0x3f   : > { %334 = vst [vmem:[%s797_s17 + $0x20] sm:$0xff] %v270_v22  ;;  %335 = vst [vmem:[%s797_s17 + $0x28] sm:$0xff] %v271_v23  ;;  %v213_v34 = vmax.f32 %v149_v25, 0.0  ;;  %v214_v35 = vmax.f32 %v150_v26, 0.0  ;;  %v215_v36 = vmax.f32 %v151_v31, 0.0  ;;  %v153_v37 = vld [vmem:[%s775_s30 + $0x78] sm:$0xff] }
  0x40   : > { %v154_v38 = vld [vmem:[%s775_s30 + $0x80] sm:$0xff]  ;;  %336 = vst [vmem:[%s797_s17 + $0x30] sm:$0xff] %v272_v27  ;;  %v274_v39 = vmin.f32 %v210_v28, 6.0  ;;  %v275_v40 = vmin.f32 %v211_v29, 6.0  ;;  %v276_v41 = vmin.f32 %v212_v30, 6.0  ;;  %v216_v42 = vmax.f32 %v152_v32, 0.0 }
  0x41   : > { %v155_v43 = vld [vmem:[%s775_s30 + $0x88] sm:$0xff]  ;;  %v156_v44 = vld [vmem:[%s775_s30 + $0x90] sm:$0xff]  ;;  %337 = vst [vmem:[%s797_s17 + $0x38] sm:$0xff] %v273_v33  ;;  %v277_v45 = vmin.f32 %v213_v34, 6.0  ;;  %v278_v46 = vmin.f32 %v214_v35, 6.0  ;;  %v279_v47 = vmin.f32 %v215_v36, 6.0 }
  0x42   : > { %v217_v48 = vmax.f32 %v153_v37, 0.0  ;;  %v157_v49 = vld [vmem:[%s775_s30 + $0x98] sm:$0xff]  ;;  %v158_v50 = vld [vmem:[%s775_s30 + $0xa0] sm:$0xff]  ;;  %338 = vst [vmem:[%s797_s17 + $0x40] sm:$0xff] %v274_v39  ;;  %339 = vst [vmem:[%s797_s17 + $0x48] sm:$0xff] %v275_v40  ;;  %v280_v51 = vmin.f32 %v216_v42, 6.0 }
  0x43   : > { %340 = vst [vmem:[%s797_s17 + $0x50] sm:$0xff] %v276_v41  ;;  %v218_v52 = vmax.f32 %v154_v38, 0.0  ;;  %v219_v53 = vmax.f32 %v155_v43, 0.0  ;;  %v220_v54 = vmax.f32 %v156_v44, 0.0  ;;  %v159_v55 = vld [vmem:[%s775_s30 + $0xa8] sm:$0xff]  ;;  %v160_v56 = vld [vmem:[%s775_s30 + $0xb0] sm:$0xff] }
  0x44   : > { %341 = vst [vmem:[%s797_s17 + $0x58] sm:$0xff] %v277_v45  ;;  %342 = vst [vmem:[%s797_s17 + $0x60] sm:$0xff] %v278_v46  ;;  %v281_v57 = vmin.f32 %v217_v48, 6.0  ;;  %v221_v58 = vmax.f32 %v157_v49, 0.0  ;;  %v222_v59 = vmax.f32 %v158_v50, 0.0  ;;  %v223_v60 = vmax.f32 %v159_v55, 0.0 }
  0x45   : > { %343 = vst [vmem:[%s797_s17 + $0x68] sm:$0xff] %v279_v47  ;;  %v161_v61 = vld [vmem:[%s775_s30 + $0xb8] sm:$0xff]  ;;  %v162_v62 = vld [vmem:[%s775_s30 + $0xc0] sm:$0xff]  ;;  %344 = vst [vmem:[%s797_s17 + $0x70] sm:$0xff] %v280_v51  ;;  %v282_v63 = vmin.f32 %v218_v52, 6.0  ;;  %v283_v0 = vmin.f32 %v219_v53, 6.0 }
  0x46   : > { %v284_v1 = vmin.f32 %v220_v54, 6.0  ;;  %v224_v2 = vmax.f32 %v160_v56, 0.0  ;;  %v163_v3 = vld [vmem:[%s775_s30 + $0xc8] sm:$0xff]  ;;  %v164_v4 = vld [vmem:[%s775_s30 + $0xd0] sm:$0xff]  ;;  %345 = vst [vmem:[%s797_s17 + $0x78] sm:$0xff] %v281_v57  ;;  %v285_v5 = vmin.f32 %v221_v58, 6.0 }
  0x47   : > { %v286_v6 = vmin.f32 %v222_v59, 6.0  ;;  %v287_v7 = vmin.f32 %v223_v60, 6.0  ;;  %v225_v8 = vmax.f32 %v161_v61, 0.0  ;;  %v165_v9 = vld [vmem:[%s775_s30 + $0xd8] sm:$0xff]  ;;  %v166_v10 = vld [vmem:[%s775_s30 + $0xe0] sm:$0xff]  ;;  %346 = vst [vmem:[%s797_s17 + $0x80] sm:$0xff] %v282_v63 }
  0x48   : > { %347 = vst [vmem:[%s797_s17 + $0x88] sm:$0xff] %v283_v0  ;;  %348 = vst [vmem:[%s797_s17 + $0x90] sm:$0xff] %v284_v1  ;;  %v288_v11 = vmin.f32 %v224_v2, 6.0  ;;  %v226_v12 = vmax.f32 %v162_v62, 0.0  ;;  %v227_v13 = vmax.f32 %v163_v3, 0.0  ;;  %v228_v14 = vmax.f32 %v164_v4, 0.0 }
  0x49   : > { %v167_v15 = vld [vmem:[%s775_s30 + $0xe8] sm:$0xff]  ;;  %v168_v16 = vld [vmem:[%s775_s30 + $0xf0] sm:$0xff]  ;;  %349 = vst [vmem:[%s797_s17 + $0x98] sm:$0xff] %v285_v5  ;;  %350 = vst [vmem:[%s797_s17 + $0xa0] sm:$0xff] %v286_v6  ;;  %v289_v17 = vmin.f32 %v225_v8, 6.0  ;;  %v229_v18 = vmax.f32 %v165_v9, 0.0 }
  0x4a   : > { %351 = vst [vmem:[%s797_s17 + $0xa8] sm:$0xff] %v287_v7  ;;  %v230_v19 = vmax.f32 %v166_v10, 0.0  ;;  %v231_v20 = vmax.f32 %v167_v15, 0.0  ;;  %v169_v21 = vld [vmem:[%s775_s30 + $0xf8] sm:$0xff]  ;;  %v170_v22 = vld [vmem:[%s775_s30 + $0x100] sm:$0xff]  ;;  %352 = vst [vmem:[%s797_s17 + $0xb0] sm:$0xff] %v288_v11 }
  0x4b   : > { %v290_v23 = vmin.f32 %v226_v12, 6.0  ;;  %v291_v24 = vmin.f32 %v227_v13, 6.0  ;;  %v292_v25 = vmin.f32 %v228_v14, 6.0  ;;  %v232_v26 = vmax.f32 %v168_v16, 0.0  ;;  %v171_v27 = vld [vmem:[%s775_s30 + $0x108] sm:$0xff]  ;;  %v172_v28 = vld [vmem:[%s775_s30 + $0x110] sm:$0xff] }
  0x4c   : > { %353 = vst [vmem:[%s797_s17 + $0xb8] sm:$0xff] %v289_v17  ;;  %v293_v29 = vmin.f32 %v229_v18, 6.0  ;;  %v294_v30 = vmin.f32 %v230_v19, 6.0  ;;  %v295_v31 = vmin.f32 %v231_v20, 6.0  ;;  %v233_v32 = vmax.f32 %v169_v21, 0.0  ;;  %v173_v33 = vld [vmem:[%s775_s30 + $0x118] sm:$0xff] }
  0x4d   : > { %v174_v34 = vld [vmem:[%s775_s30 + $0x120] sm:$0xff]  ;;  %354 = vst [vmem:[%s797_s17 + $0xc0] sm:$0xff] %v290_v23  ;;  %355 = vst [vmem:[%s797_s17 + $0xc8] sm:$0xff] %v291_v24  ;;  %v296_v35 = vmin.f32 %v232_v26, 6.0  ;;  %v234_v36 = vmax.f32 %v170_v22, 0.0  ;;  %v235_v37 = vmax.f32 %v171_v27, 0.0 }
  0x4e   : > { %356 = vst [vmem:[%s797_s17 + $0xd0] sm:$0xff] %v292_v25  ;;  %v236_v38 = vmax.f32 %v172_v28, 0.0  ;;  %v175_v39 = vld [vmem:[%s775_s30 + $0x128] sm:$0xff]  ;;  %v176_v40 = vld [vmem:[%s775_s30 + $0x130] sm:$0xff]  ;;  %357 = vst [vmem:[%s797_s17 + $0xd8] sm:$0xff] %v293_v29  ;;  %v297_v41 = vmin.f32 %v233_v32, 6.0 }
  0x4f   : > { %358 = vst [vmem:[%s797_s17 + $0xe0] sm:$0xff] %v294_v30  ;;  %359 = vst [vmem:[%s797_s17 + $0xe8] sm:$0xff] %v295_v31  ;;  %v237_v42 = vmax.f32 %v173_v33, 0.0  ;;  %v238_v43 = vmax.f32 %v174_v34, 0.0  ;;  %v239_v44 = vmax.f32 %v175_v39, 0.0  ;;  %v177_v45 = vld [vmem:[%s775_s30 + $0x138] sm:$0xff] }
  0x50   : > { %v178_v46 = vld [vmem:[%s775_s30 + $0x140] sm:$0xff]  ;;  %360 = vst [vmem:[%s797_s17 + $0xf0] sm:$0xff] %v296_v35  ;;  %v298_v47 = vmin.f32 %v234_v36, 6.0  ;;  %v299_v48 = vmin.f32 %v235_v37, 6.0  ;;  %v300_v49 = vmin.f32 %v236_v38, 6.0  ;;  %v240_v50 = vmax.f32 %v176_v40, 0.0 }
  0x51   : > { %v179_v51 = vld [vmem:[%s775_s30 + $0x148] sm:$0xff]  ;;  %v180_v52 = vld [vmem:[%s775_s30 + $0x150] sm:$0xff]  ;;  %361 = vst [vmem:[%s797_s17 + $0xf8] sm:$0xff] %v297_v41  ;;  %v301_v53 = vmin.f32 %v237_v42, 6.0  ;;  %v302_v54 = vmin.f32 %v238_v43, 6.0  ;;  %v303_v55 = vmin.f32 %v239_v44, 6.0 }
  0x52   : > { %v241_v56 = vmax.f32 %v177_v45, 0.0  ;;  %v181_v57 = vld [vmem:[%s775_s30 + $0x158] sm:$0xff]  ;;  %v182_v58 = vld [vmem:[%s775_s30 + $0x160] sm:$0xff]  ;;  %362 = vst [vmem:[%s797_s17 + $0x100] sm:$0xff] %v298_v47  ;;  %363 = vst [vmem:[%s797_s17 + $0x108] sm:$0xff] %v299_v48  ;;  %v304_v59 = vmin.f32 %v240_v50, 6.0 }
  0x53   : > { %364 = vst [vmem:[%s797_s17 + $0x110] sm:$0xff] %v300_v49  ;;  %v242_v60 = vmax.f32 %v178_v46, 0.0  ;;  %v243_v61 = vmax.f32 %v179_v51, 0.0  ;;  %v244_v62 = vmax.f32 %v180_v52, 0.0  ;;  %v183_v63 = vld [vmem:[%s775_s30 + $0x168] sm:$0xff]  ;;  %v184_v0 = vld [vmem:[%s775_s30 + $0x170] sm:$0xff] }
  0x54   : > { %365 = vst [vmem:[%s797_s17 + $0x118] sm:$0xff] %v301_v53  ;;  %366 = vst [vmem:[%s797_s17 + $0x120] sm:$0xff] %v302_v54  ;;  %v305_v1 = vmin.f32 %v241_v56, 6.0  ;;  %v245_v2 = vmax.f32 %v181_v57, 0.0  ;;  %v246_v3 = vmax.f32 %v182_v58, 0.0  ;;  %v247_v4 = vmax.f32 %v183_v63, 0.0 }
  0x55   : > { %367 = vst [vmem:[%s797_s17 + $0x128] sm:$0xff] %v303_v55  ;;  %v185_v5 = vld [vmem:[%s775_s30 + $0x178] sm:$0xff]  ;;  %v186_v6 = vld [vmem:[%s775_s30 + $0x180] sm:$0xff]  ;;  %368 = vst [vmem:[%s797_s17 + $0x130] sm:$0xff] %v304_v59  ;;  %v306_v7 = vmin.f32 %v242_v60, 6.0  ;;  %v307_v8 = vmin.f32 %v243_v61, 6.0 }
  0x56   : > { %v308_v9 = vmin.f32 %v244_v62, 6.0  ;;  %v248_v10 = vmax.f32 %v184_v0, 0.0  ;;  %v187_v11 = vld [vmem:[%s775_s30 + $0x188] sm:$0xff]  ;;  %v188_v12 = vld [vmem:[%s775_s30 + $0x190] sm:$0xff]  ;;  %369 = vst [vmem:[%s797_s17 + $0x138] sm:$0xff] %v305_v1  ;;  %v309_v13 = vmin.f32 %v245_v2, 6.0 }
  0x57   : > { %v310_v14 = vmin.f32 %v246_v3, 6.0  ;;  %v311_v15 = vmin.f32 %v247_v4, 6.0  ;;  %v249_v16 = vmax.f32 %v185_v5, 0.0  ;;  %v189_v17 = vld [vmem:[%s775_s30 + $0x198] sm:$0xff]  ;;  %v190_v18 = vld [vmem:[%s775_s30 + $0x1a0] sm:$0xff]  ;;  %370 = vst [vmem:[%s797_s17 + $0x140] sm:$0xff] %v306_v7 }
  0x58   : > { %371 = vst [vmem:[%s797_s17 + $0x148] sm:$0xff] %v307_v8  ;;  %372 = vst [vmem:[%s797_s17 + $0x150] sm:$0xff] %v308_v9  ;;  %v312_v19 = vmin.f32 %v248_v10, 6.0  ;;  %v250_v20 = vmax.f32 %v186_v6, 0.0  ;;  %v251_v21 = vmax.f32 %v187_v11, 0.0  ;;  %v252_v22 = vmax.f32 %v188_v12, 0.0 }
  0x59   : > { %v191_v23 = vld [vmem:[%s775_s30 + $0x1a8] sm:$0xff]  ;;  %v192_v24 = vld [vmem:[%s775_s30 + $0x1b0] sm:$0xff]  ;;  %373 = vst [vmem:[%s797_s17 + $0x158] sm:$0xff] %v309_v13  ;;  %374 = vst [vmem:[%s797_s17 + $0x160] sm:$0xff] %v310_v14  ;;  %v313_v25 = vmin.f32 %v249_v16, 6.0  ;;  %v253_v26 = vmax.f32 %v189_v17, 0.0 }
  0x5a   : > { %375 = vst [vmem:[%s797_s17 + $0x168] sm:$0xff] %v311_v15  ;;  %v254_v27 = vmax.f32 %v190_v18, 0.0  ;;  %v255_v28 = vmax.f32 %v191_v23, 0.0  ;;  %v193_v29 = vld [vmem:[%s775_s30 + $0x1b8] sm:$0xff]  ;;  %v194_v30 = vld [vmem:[%s775_s30 + $0x1c0] sm:$0xff]  ;;  %376 = vst [vmem:[%s797_s17 + $0x170] sm:$0xff] %v312_v19 }
  0x5b   : > { %v314_v31 = vmin.f32 %v250_v20, 6.0  ;;  %v315_v32 = vmin.f32 %v251_v21, 6.0  ;;  %v316_v33 = vmin.f32 %v252_v22, 6.0  ;;  %v256_v34 = vmax.f32 %v192_v24, 0.0  ;;  %v195_v35 = vld [vmem:[%s775_s30 + $0x1c8] sm:$0xff]  ;;  %v196_v36 = vld [vmem:[%s775_s30 + $0x1d0] sm:$0xff] }
  0x5c   : > { %377 = vst [vmem:[%s797_s17 + $0x178] sm:$0xff] %v313_v25  ;;  %v317_v37 = vmin.f32 %v253_v26, 6.0  ;;  %v318_v38 = vmin.f32 %v254_v27, 6.0  ;;  %v319_v39 = vmin.f32 %v255_v28, 6.0  ;;  %v257_v40 = vmax.f32 %v193_v29, 0.0  ;;  %v197_v41 = vld [vmem:[%s775_s30 + $0x1d8] sm:$0xff] }
  0x5d   : > { %v198_v42 = vld [vmem:[%s775_s30 + $0x1e0] sm:$0xff]  ;;  %378 = vst [vmem:[%s797_s17 + $0x180] sm:$0xff] %v314_v31  ;;  %379 = vst [vmem:[%s797_s17 + $0x188] sm:$0xff] %v315_v32  ;;  %v320_v43 = vmin.f32 %v256_v34, 6.0  ;;  %v258_v44 = vmax.f32 %v194_v30, 0.0  ;;  %v259_v45 = vmax.f32 %v195_v35, 0.0 }
  0x5e   : > { %380 = vst [vmem:[%s797_s17 + $0x190] sm:$0xff] %v316_v33  ;;  %v260_v46 = vmax.f32 %v196_v36, 0.0  ;;  %v199_v47 = vld [vmem:[%s775_s30 + $0x1e8] sm:$0xff]  ;;  %v200_v48 = vld [vmem:[%s775_s30 + $0x1f0] sm:$0xff]  ;;  %381 = vst [vmem:[%s797_s17 + $0x198] sm:$0xff] %v317_v37  ;;  %v321_v49 = vmin.f32 %v257_v40, 6.0 }
  0x5f   : > { %382 = vst [vmem:[%s797_s17 + $0x1a0] sm:$0xff] %v318_v38  ;;  %383 = vst [vmem:[%s797_s17 + $0x1a8] sm:$0xff] %v319_v39  ;;  %v261_v50 = vmax.f32 %v197_v41, 0.0  ;;  %v262_v51 = vmax.f32 %v198_v42, 0.0  ;;  %v263_v52 = vmax.f32 %v199_v47, 0.0  ;;  %v201_v53 = vld [vmem:[%s775_s30 + $0x1f8] sm:$0xff] }
  0x60   : > { %384 = vst [vmem:[%s797_s17 + $0x1b0] sm:$0xff] %v320_v43  ;;  %v322_v54 = vmin.f32 %v258_v44, 6.0  ;;  %v323_v55 = vmin.f32 %v259_v45, 6.0  ;;  %v324_v56 = vmin.f32 %v260_v46, 6.0  ;;  %v264_v57 = vmax.f32 %v200_v48, 0.0  ;;  %385 = vst [vmem:[%s797_s17 + $0x1b8] sm:$0xff] %v321_v49 }
  0x61   : > { %v325_v58 = vmin.f32 %v261_v50, 6.0  ;;  %v326_v59 = vmin.f32 %v262_v51, 6.0  ;;  %v327_v60 = vmin.f32 %v263_v52, 6.0  ;;  %v265_v61 = vmax.f32 %v201_v53, 0.0  ;;  %s395_s3 = scalar_lea.sflag [#allocation4], %s769_s23  ;;  %s582_s4 = scalar_lea.vmem %s917_s27, 8192 }
  0x62   : > { %386 = vst [vmem:[%s797_s17 + $0x1c0] sm:$0xff] %v322_v54  ;;  %387 = vst [vmem:[%s797_s17 + $0x1c8] sm:$0xff] %v323_v55  ;;  %v328_v62 = vmin.f32 %v264_v57, 6.0  ;;  %p583_p6 = scmp.ne.s32.totalorder %s917_s27, %s582_s4  ;;  %p973_p10 = scmp.ne.s32.totalorder %s970_s18, 0 }
  0x63   : > { %388 = vst [vmem:[%s797_s17 + $0x1d0] sm:$0xff] %v324_v56  ;;  %389 = vst [vmem:[%s797_s17 + $0x1d8] sm:$0xff] %v325_v58  ;;  %v329_v63 = vmin.f32 %v265_v61, 6.0  ;;  %s653_s10 = smov [#allocation5]  }
  0x64   : > { %390 = vst [vmem:[%s797_s17 + $0x1e0] sm:$0xff] %v326_v59  ;;  %391 = vst [vmem:[%s797_s17 + $0x1e8] sm:$0xff] %v327_v60  ;;  %p584_p11 = pnand %p583_p6, %p973_p10  ;;  %s586_s5 = sshll.u32 %s653_s10, 4  ;;  %s587_s5 = int_to_ptr.vmem [resolvable:$false] %s586_s5 }
  0x65   : > { %392 = vst [vmem:[%s797_s17 + $0x1f0] sm:$0xff] %v328_v62  ;;  %393 = vst [vmem:[%s797_s17 + $0x1f8] sm:$0xff] %v329_v63  ;;  %s588_s11 = scalar_lea.vmem %s587_s5, 16384  ;;  %p589_p8 = scmp.lt.s32.totalorder %s917_s27, %s587_s5 }
  0x66   : > { %p585_p12 = pneg %p584_p11  ;;  %p590_p9 = scmp.lt.s32.totalorder %s588_s11, %s582_s4 }
  0x68   : > { %p591_p13 = por %p590_p9, %p589_p8 }
  0x6a   : > { %p592_p1 = pnand %p591_p13, %p585_p12 }
  0x6c   : > { %595 = shalt.err (!%p592_p1)
}
  0x6d   : > { %s596_s13 = scalar_lea.hbm %s915_s2, 8192  ;;  %s600_s20 = scalar_lea.hbm %s966_s1, 65536 }
  0x6e   : > { %p597_p3 = scmp.ne.s32.totalorder %s915_s2, %s596_s13  ;;  %p601_p0 = scmp.lt.u32.totalorder %s915_s2, %s966_s1 }
  0x6f   : > { %p602_p2 = scmp.lt.u32.totalorder %s600_s20, %s596_s13  ;;  %p604_p6 = scmp.lt.u32.totalorder %s596_s13, %s915_s2 }
  0x70   : > { %p598_p4 = pnand %p597_p3, %p973_p10 }
  0x71   : > { %p603_p7 = por %p602_p2, %p601_p0 }
  0x72   : > { %p599_p5 = pneg %p598_p4 }
  0x73   : > { %p605_p11 = por %p604_p6, %p603_p7 }
  0x75   : > { %p606_p12 = pnand %p605_p11, %p599_p5 }
  0x77   : > { %609 = shalt.err (!%p606_p12)
}
  0x78   : > { %s654_s24 = smov 1024   ;;  %s655_s26 = smov 64  }
  0x79   : > { %504 = dma.vmem_to_hbm [thread:$0]  (%p973_p10), %s917_s27, 8192, %s915_s2, %s395_s3, %s654_s24, %s654_s24, %s655_s26  }
  0x7a PF: > { %p515_p8 = scmp.ge.s32.totalorder %s648_s9, 2  ;;  %s424_s30 = sand.u32 1, %s636_s6  }
  0x7b   : > { %p974_p9 = scmp.ne.s32.totalorder %s971_s19, 0  ;;  %s425_s25 = scalar_lea.sflag [#allocation4], %s424_s30 }
  0x7d   : > { %p511_p13 = pnand %p515_p8, %p974_p9 }
  0x7f   : > { %631 = dma.done.wait (!%p511_p13), %s425_s25, 8192  }
  0x80   : > { %633 = vsyncadd (!%p511_p13), %s425_s25, 4294959104  ;;  %p14_p1 = scmp.ge.s32.totalorder %s691_s12, 10   ;;  %s975_s6 = smov %s640_s7 }
  0x81   : > { %s976_s7 = smov %s644_s8  ;;  %s977_s8 = smov %s703_s15 }
  0x82   : > { %s978_s9 = smov %s691_s12  ;;  %16 = sbr.rel (!%p14_p1) target bundleno = 5 (0x5), region = 69 }
  0x89   :  { %430 = vsyncpa [#allocation3], 1 }
  0x8a   :  { %432 = vsyncpa [#allocation3 + $0x1], 1 }
  0x8b   :  { %433 = vsyncpa [#allocation4], 1 }
  0x8c   :  { %435 = vsyncpa [#allocation4 + $0x1], 1 }

</bundles_post_ra>
